<compile_context>
chip_gen: v6e
topology: v6e:2x2x1
jax: 0.10.0
libtpu: 0.0.40
codegen_flags: <defaults>
</compile_context>

<pallas_src>
import jax
import jax.numpy as jnp
from jax.experimental import pallas as pl
from jax.experimental.pallas import tpu as pltpu


# ----------------------------------------------------------------------------
# Preferred path: metadata-only reshape (exactly what torch .view() does).
# ----------------------------------------------------------------------------
def unflatten(x, channel, height, width):
    n, d = x.shape
    assert d == channel * height * width, "flat dim must equal C*H*W"
    return x.reshape(n, channel, height, width)


# ----------------------------------------------------------------------------
# Pallas kernel variant (only needed when this must be a kernel, e.g. to fuse
# with neighboring Pallas stages).
# ----------------------------------------------------------------------------
def _copy_kernel(x_ref, o_ref):
    # Straight VMEM->VMEM copy of the current (tn, td) tile.
    o_ref[...] = x_ref[...]


def _tile_size(dim, unit, max_tile):
    """Largest divisor of `dim` that is a multiple of `unit` and <= max_tile.

    Falls back to the full extent `dim` when `dim` is not a multiple of
    `unit` (a full-extent block dim is always legal on TPU).
    """
    if dim % unit != 0:
        return dim
    best = unit
    t = unit
    cap = min(dim, max_tile)
    while t <= cap:
        if dim % t == 0:
            best = t
        t += unit
    return best


def unflatten_pallas(x, channel, height, width):
    """Identity-copy kernel over the flat (N, D) slab, then metadata reshape."""
    n, d = x.shape
    assert d == channel * height * width, "flat dim must equal C*H*W"

    itemsize = jnp.dtype(x.dtype).itemsize
    # Sublane multiple for this dtype (8 for f32, 16 for bf16, 32 for int8).
    sub = 8 * max(1, 4 // itemsize)

    # Lane tile: keep the output lane-dense (multiple of 128) when possible so
    # stores are unmasked vst; otherwise take the full extent (still legal).
    td = _tile_size(d, 128, 512) if d % 128 == 0 else d

    # Sublane tile: bound per-buffer footprint to ~2 MiB so that
    # 2 in + 2 out double-buffered tiles stay well under v7x's 64 MiB VMEM.
    budget_rows = max(sub, (2 * 1024 * 1024) // max(1, td * itemsize))
    tn = _tile_size(n, sub, budget_rows) if n % sub == 0 else n

    grid = (n // tn, d // td)  # exact: tn | n and td | d (or full extents)

    flat = pl.pallas_call(
        _copy_kernel,
        out_shape=jax.ShapeDtypeStruct((n, d), x.dtype),
        grid=grid,
        in_specs=[pl.BlockSpec((tn, td), lambda i, j: (i, j))],
        out_specs=pl.BlockSpec((tn, td), lambda i, j: (i, j)),
        # Alias the input buffer onto the output: the identity copy becomes
        # effectively in-place (no second (N, D) HBM array materialized).
        input_output_aliases={0: 0},
        compiler_params=pltpu.CompilerParams(
            dimension_semantics=("parallel", "parallel"),
        ),
    )(x)

    # Metadata-only reshape (glue), identical to torch .view(N, C, H, W).
    return flat.reshape(n, channel, height, width)


if __name__ == "__main__":
    # Small shapes consistent with the module: batch=2, C=4, H=W=16.
    N, C, H, W = 2, 4, 16, 16
    key = jax.random.PRNGKey(0)
    x = jax.random.normal(key, (N, C * H * W), dtype=jnp.float32)

    # Reference semantics: torch .view == row-major reshape.
    ref = x.reshape(N, C, H, W)

    # Preferred zero-cost path.
    out_fast = unflatten(x, C, H, W)
    jax.block_until_ready(out_fast)
    assert out_fast.shape == (N, C, H, W)
    assert jnp.array_equal(out_fast, ref)

    # Pallas kernel path (tiled, pipelined, in-place aliased copy).
    unflatten_kernel = jax.jit(unflatten_pallas, static_argnums=(1, 2, 3))
    out_kernel = unflatten_kernel(x, C, H, W)
    jax.block_until_ready(out_kernel)

    assert out_kernel.shape == (N, C, H, W)
    assert out_kernel.dtype == x.dtype
    assert jnp.array_equal(out_kernel, ref)

    print("KERNEL_OK")
</pallas_src>

<mosaic_0001>
module attributes {stable_mosaic.version = 11 : i64} {
  func.func @_copy_kernel(%arg0: i32, %arg1: i32, %arg2: memref<2x512xf32, #tpu.memory_space<vmem>>, %arg3: memref<2x512xf32, #tpu.memory_space<vmem>>) attributes {dimension_semantics = [#tpu.dimension_semantics<parallel>, #tpu.dimension_semantics<parallel>], iteration_bounds = array<i64: 1, 2>, scalar_prefetch = 0 : i64, scratch_operands = 0 : i64, tpu.core_type = #tpu.core_type<tc>, window_params = [{transform_indices = @transform_0, window_bounds = array<i64: 2, 512>}, {transform_indices = @transform_1, window_bounds = array<i64: 2, 512>}]} {
    %c0 = arith.constant 0 : index
    %c0_0 = arith.constant 0 : index
    %0 = vector.load %arg2[%c0, %c0_0] : memref<2x512xf32, #tpu.memory_space<vmem>>, vector<2x512xf32>
    %c0_1 = arith.constant 0 : index
    %c0_2 = arith.constant 0 : index
    %1 = vector.load %arg3[%c0_1, %c0_2] : memref<2x512xf32, #tpu.memory_space<vmem>>, vector<2x512xf32>
    tpu.vector_store %arg3[%c0_1, %c0_2], %0 {strides = array<i32>} : memref<2x512xf32, #tpu.memory_space<vmem>>, vector<2x512xf32>,
    return
  }
  func.func @transform_0(%arg0: i32, %arg1: i32) -> (i32, i32) {
    %c0_i32 = arith.constant 0 : i32
    return %arg0, %arg1 : i32, i32
  }
  func.func @transform_1(%arg0: i32, %arg1: i32) -> (i32, i32) {
    %c0_i32 = arith.constant 0 : i32
    return %arg0, %arg1 : i32, i32
  }
}

</mosaic_0001>

<bundles_post_ra>
// kernel: unflatten_pallas.1
= control target key start
LH: loop header
LB: loop body
LE: loop exit
PB: predicated region body
PF: predicated region fallthrough
CT: control target
= control target key end

     0   :  { %s292_s6 = smov 0   ;;  %s296_s7 = smov 0   ;;  %s320_s0 = inlined_call_operand.vmem [shape: f32[2,1024], index: 0, kind: input, shape index: {}, may-alias: {0,1}]   ;;  %s321_s1 = inlined_call_operand.vmem [shape: f32[2,1024], index: 1, kind: output, shape index: {}, may-alias: {0,1}]  }
   0x1   :  { %s300_s8 = smov 0  }
   0x2 LB: > { %s20_s9 = sadd.s32 1, %s298_s7  ;;  %p249_p0 = scmp.ge.s32.totalorder %s302_s8, 1  ;;  %s302_s8 = sphi %s300_s8, %s11_s8   ;;  %s298_s7 = sphi %s296_s7, %s297_s7   ;;  %s294_s6 = sphi %s292_s6, %s293_s6  }
   0x3   : > { %p21_p1 = scmp.ge.s32.totalorder %s20_s9, 2  ;;  %p108_p2 = scmp.lt.s32.totalorder %s302_s8, 3 }
   0x5   : > { %s323_s9 = smov (%p21_p1, %s20_s9), 0  ;;  %p109_p3 = pnand %p249_p0, %p108_p2 }
   0x6   : > { %s250_s10 = sshll.u32 (!%p109_p3), %s294_s6, 2 }
   0x7   : > { %112 = sbr.rel (%p109_p3) target bundleno = 17 (0x11), region = 24  ;;  %p139_p4 = scmp.lt.s32.totalorder (!%p109_p3), %s250_s10, 7 }
   0xc   : > { %s325_s10 = smov (!%p139_p4, %s250_s10), 7 }
   0xd   : > { %s251_s11 = sshll.u32 %s325_s10, 1 }
   0xe   : > { %s144_s14 = scalar_lea.vmem %s320_s0, %s251_s11  ;;  %s154_s17 = scalar_lea.vmem %s321_s1, %s251_s11 }
   0xf   : > { %v156_v0 = vld [vmem:[%s144_s14] sm:$0xff] }
  0x10   : > { %157 = vst [vmem:[%s154_s17] sm:$0xff] %v156_v0 }
  0x11 PF: > { %s11_s8 = sadd.s32 1, %s302_s8   ;;  %s293_s6 = smov %s298_s7  }
  0x12   : > { %p8_p5 = scmp.ge.s32.totalorder %s11_s8, 4   ;;  %s297_s7 = smov %s323_s9  }
  0x14   :  { %10 = sbr.rel (!%p8_p5) target bundleno = 2 (0x2), region = 54 }

</bundles_post_ra>
